<compile_context>
chip_gen: v5e
topology: v5e:2x2
jax: 0.10.0
libtpu: 0.0.40
codegen_flags: <defaults>
</compile_context>

<pallas_src>
import jax
import jax.numpy as jnp
from jax.experimental import pallas as pl
from jax.experimental.pallas import tpu as pltpu

D_IN = 28 * 28  # 784
HIDDEN = 256
NUM_CLASSES = 10


def _round_up(x, m):
    return (x + m - 1) // m * m


def fcn_kernel(x_ref, w1_ref, b1_ref, w2_ref, b2_ref, o_ref):
    # Cast the f32 input tile to bf16 in-kernel (fused; no extra HBM pass).
    x = x_ref[...].astype(jnp.bfloat16)
    # layer 1: bf16 x bf16 matmul on MXU, f32 accumulation, f32 bias + ReLU
    h = jnp.dot(x, w1_ref[...], preferred_element_type=jnp.float32)
    h = jnp.maximum(h + b1_ref[...], 0.0)  # .clamp(min=0)
    # layer 2: back to bf16 for the MXU, accumulate in f32, f32 bias
    y = jnp.dot(h.astype(jnp.bfloat16), w2_ref[...],
                preferred_element_type=jnp.float32)
    o_ref[...] = (y + b2_ref[...]).astype(o_ref.dtype)


def prepare_params(w1_t, b1, w2_t, b2):
    """One-time parameter prep (hoisted out of the per-call forward path).

    w1_t: [784, 256], w2_t: [256, 10] (pre-transposed so y = x @ W + b).
    Returns bf16 weights (MXU-native) and f32 row-shaped biases.
    """
    return (w1_t.astype(jnp.bfloat16),
            b1.reshape(1, -1).astype(jnp.float32),
            w2_t.astype(jnp.bfloat16),
            b2.reshape(1, -1).astype(jnp.float32))


def fcn_forward(x, w1b, b1r, w2b, b2r, *, tb=512):
    """Forward pass matching PyTorch FCN.

    x: any shape with 784 trailing elements per sample (like x.view(-1, 784)),
       in its native dtype (typically f32); the bf16 cast happens in-kernel.
    """
    x2d = x.reshape(-1, D_IN)
    B = x2d.shape[0]
    D_in, H = w1b.shape
    C = w2b.shape[1]

    # Batch tile: multiple of 16 rows (bf16 sublane quantum), capped at `tb`.
    TB = min(tb, _round_up(B, 16))
    # v7x: make sure the grid has >= 2 parallel steps so both TensorCores get
    # work (no-op on v5e/v6e, which have a single TensorCore).
    if TB > 16 and pl.cdiv(B, TB) < 2:
        TB = _round_up(pl.cdiv(TB, 2), 16)

    grid = (pl.cdiv(B, TB),)

    out = pl.pallas_call(
        fcn_kernel,
        out_shape=jax.ShapeDtypeStruct((B, C), jnp.float32),
        grid=grid,
        in_specs=[
            # x tile: marches over the batch, double-buffered by Pallas.
            pl.BlockSpec((TB, D_in), lambda i: (i, 0)),
            # weights / biases: constant index_map -> resident in VMEM.
            pl.BlockSpec((D_in, H), lambda i: (0, 0)),
            pl.BlockSpec((1, H), lambda i: (0, 0)),
            pl.BlockSpec((H, C), lambda i: (0, 0)),
            pl.BlockSpec((1, C), lambda i: (0, 0)),
        ],
        # True (TB, 10) block: last dim equals the full array dim, so no pad
        # and no wrapper slice pass; OOB rows of the tail block are dropped.
        out_specs=pl.BlockSpec((TB, C), lambda i: (i, 0)),
        compiler_params=pltpu.CompilerParams(
            dimension_semantics=("parallel",)),
    )(x2d, w1b, b1r, w2b, b2r)

    return out


def init_params(key, D_in=D_IN, H=HIDDEN, num_classes=NUM_CLASSES):
    """Deterministic PyTorch-style init: U(-1/sqrt(fan_in), 1/sqrt(fan_in))."""
    k1, k2, k3, k4 = jax.random.split(key, 4)
    bound1 = 1.0 / jnp.sqrt(jnp.float32(D_in))
    bound2 = 1.0 / jnp.sqrt(jnp.float32(H))
    # stored pre-transposed: [in, out]
    w1_t = jax.random.uniform(k1, (D_in, H), jnp.float32, -bound1, bound1)
    b1 = jax.random.uniform(k2, (H,), jnp.float32, -bound1, bound1)
    w2_t = jax.random.uniform(k3, (H, num_classes), jnp.float32, -bound2, bound2)
    b2 = jax.random.uniform(k4, (num_classes,), jnp.float32, -bound2, bound2)
    return w1_t, b1, w2_t, b2


if __name__ == "__main__":
    key = jax.random.PRNGKey(0)
    kx, kp = jax.random.split(key)
    # small batch, MNIST-like input (B, 1, 28, 28); forward flattens to (B, 784)
    x = jax.random.normal(kx, (2, 1, 28, 28), jnp.float32)
    w1_t, b1, w2_t, b2 = init_params(kp)

    # One-time parameter prep, then jit the forward (shapes are static).
    params = prepare_params(w1_t, b1, w2_t, b2)
    fwd = jax.jit(fcn_forward)

    y = fwd(x, *params)
    y = jax.block_until_ready(y)
    assert y.shape == (2, NUM_CLASSES)

    # reference in plain JAX with the same bf16-weights / f32-accumulate recipe
    x2d = x.reshape(-1, D_IN).astype(jnp.bfloat16)
    h_ref = jnp.maximum(
        jnp.dot(x2d, w1_t.astype(jnp.bfloat16),
                preferred_element_type=jnp.float32) + b1, 0.0)
    y_ref = jnp.dot(h_ref.astype(jnp.bfloat16), w2_t.astype(jnp.bfloat16),
                    preferred_element_type=jnp.float32) + b2
    assert jnp.allclose(y, y_ref, atol=2e-2, rtol=2e-2), (
        float(jnp.max(jnp.abs(y - y_ref))))

    # sanity vs full-f32 reference (loose tolerance for bf16 compute path)
    x32 = x.reshape(-1, D_IN)
    y_f32 = jnp.maximum(x32 @ w1_t + b1, 0.0) @ w2_t + b2
    assert jnp.allclose(y, y_f32, atol=0.1, rtol=0.1)

    # ragged / larger batch exercises the partial tail block + multi-step grid
    xb2 = jax.random.normal(jax.random.PRNGKey(1), (100, 1, 28, 28), jnp.float32)
    y2 = jax.block_until_ready(fwd(xb2, *params))
    x2d2 = xb2.reshape(-1, D_IN)
    y2_f32 = jnp.maximum(x2d2 @ w1_t + b1, 0.0) @ w2_t + b2
    assert y2.shape == (100, NUM_CLASSES)
    assert jnp.allclose(y2, y2_f32, atol=0.1, rtol=0.1)

    print("KERNEL_OK")
</pallas_src>

<mosaic_0001>
module attributes {stable_mosaic.version = 11 : i64} {
  func.func @fcn_kernel(%arg0: i32, %arg1: memref<16x784xf32, #tpu.memory_space<vmem>>, %arg2: memref<784x256xbf16, #tpu.memory_space<vmem>>, %arg3: memref<1x256xf32, #tpu.memory_space<vmem>>, %arg4: memref<256x10xbf16, #tpu.memory_space<vmem>>, %arg5: memref<1x10xf32, #tpu.memory_space<vmem>>, %arg6: memref<16x10xf32, #tpu.memory_space<vmem>>) attributes {dimension_semantics = [#tpu.dimension_semantics<parallel>], iteration_bounds = array<i64: 1>, scalar_prefetch = 0 : i64, scratch_operands = 0 : i64, tpu.core_type = #tpu.core_type<tc>, window_params = [{transform_indices = @transform_0, window_bounds = array<i64: 16, 784>}, {pipeline_mode = #tpu.pipeline_mode<synchronous>, transform_indices = @transform_1, window_bounds = array<i64: 784, 256>}, {pipeline_mode = #tpu.pipeline_mode<synchronous>, transform_indices = @transform_2, window_bounds = array<i64: 1, 256>}, {pipeline_mode = #tpu.pipeline_mode<synchronous>, transform_indices = @transform_3, window_bounds = array<i64: 256, 10>}, {pipeline_mode = #tpu.pipeline_mode<synchronous>, transform_indices = @transform_4, window_bounds = array<i64: 1, 10>}, {transform_indices = @transform_5, window_bounds = array<i64: 16, 10>}]} {
    %c0 = arith.constant 0 : index
    %c0_0 = arith.constant 0 : index
    %0 = vector.load %arg1[%c0, %c0_0] : memref<16x784xf32, #tpu.memory_space<vmem>>, vector<16x784xf32>
    %1 = arith.truncf %0 : vector<16x784xf32> to vector<16x784xbf16>
    %c0_1 = arith.constant 0 : index
    %c0_2 = arith.constant 0 : index
    %2 = vector.load %arg2[%c0_1, %c0_2] : memref<784x256xbf16, #tpu.memory_space<vmem>>, vector<784x256xbf16>
    %cst = arith.constant dense<0.000000e+00> : vector<16x256xf32>
    %3 = tpu.matmul %1, %2, %cst {dimension_numbers = #tpu.dot_dimension_numbers<[1], [0], [0], [1], [0, 0, 1, 1], [], []>} : vector<16x784xbf16>, vector<784x256xbf16>, vector<16x256xf32> -> vector<16x256xf32>
    %c0_3 = arith.constant 0 : index
    %c0_4 = arith.constant 0 : index
    %4 = vector.load %arg3[%c0_3, %c0_4] : memref<1x256xf32, #tpu.memory_space<vmem>>, vector<1x256xf32>
    %5 = vector.broadcast %4 : vector<1x256xf32> to vector<16x256xf32>
    %6 = arith.addf %3, %5 : vector<16x256xf32>
    %cst_5 = arith.constant 0.000000e+00 : f32
    %7 = vector.broadcast %cst_5 : f32 to vector<16x256xf32>
    %8 = arith.maximumf %6, %7 : vector<16x256xf32>
    %9 = arith.truncf %8 : vector<16x256xf32> to vector<16x256xbf16>
    %c0_6 = arith.constant 0 : index
    %c0_7 = arith.constant 0 : index
    %10 = vector.load %arg4[%c0_6, %c0_7] : memref<256x10xbf16, #tpu.memory_space<vmem>>, vector<256x10xbf16>
    %cst_8 = arith.constant dense<0.000000e+00> : vector<16x10xf32>
    %11 = tpu.matmul %9, %10, %cst_8 {dimension_numbers = #tpu.dot_dimension_numbers<[1], [0], [0], [1], [0, 0, 1, 1], [], []>} : vector<16x256xbf16>, vector<256x10xbf16>, vector<16x10xf32> -> vector<16x10xf32>
    %c0_9 = arith.constant 0 : index
    %c0_10 = arith.constant 0 : index
    %12 = vector.load %arg5[%c0_9, %c0_10] : memref<1x10xf32, #tpu.memory_space<vmem>>, vector<1x10xf32>
    %13 = vector.broadcast %12 : vector<1x10xf32> to vector<16x10xf32>
    %14 = arith.addf %11, %13 : vector<16x10xf32>
    %c0_11 = arith.constant 0 : index
    %c0_12 = arith.constant 0 : index
    %15 = vector.load %arg6[%c0_11, %c0_12] : memref<16x10xf32, #tpu.memory_space<vmem>>, vector<16x10xf32>
    tpu.vector_store %arg6[%c0_11, %c0_12], %14 {strides = array<i32>} : memref<16x10xf32, #tpu.memory_space<vmem>>, vector<16x10xf32>,
    return
  }
  func.func @transform_0(%arg0: i32) -> (i32, i32) {
    %c0_i32 = arith.constant 0 : i32
    %c0_i32_0 = arith.constant 0 : i32
    return %arg0, %c0_i32 : i32, i32
  }
  func.func @transform_1(%arg0: i32) -> (i32, i32) {
    %c0_i32 = arith.constant 0 : i32
    %c0_i32_0 = arith.constant 0 : i32
    %c0_i32_1 = arith.constant 0 : i32
    return %c0_i32, %c0_i32_0 : i32, i32
  }
  func.func @transform_2(%arg0: i32) -> (i32, i32) {
    %c0_i32 = arith.constant 0 : i32
    %c0_i32_0 = arith.constant 0 : i32
    %c0_i32_1 = arith.constant 0 : i32
    return %c0_i32, %c0_i32_0 : i32, i32
  }
  func.func @transform_3(%arg0: i32) -> (i32, i32) {
    %c0_i32 = arith.constant 0 : i32
    %c0_i32_0 = arith.constant 0 : i32
    %c0_i32_1 = arith.constant 0 : i32
    return %c0_i32, %c0_i32_0 : i32, i32
  }
  func.func @transform_4(%arg0: i32) -> (i32, i32) {
    %c0_i32 = arith.constant 0 : i32
    %c0_i32_0 = arith.constant 0 : i32
    %c0_i32_1 = arith.constant 0 : i32
    return %c0_i32, %c0_i32_0 : i32, i32
  }
  func.func @transform_5(%arg0: i32) -> (i32, i32) {
    %c0_i32 = arith.constant 0 : i32
    %c0_i32_0 = arith.constant 0 : i32
    return %arg0, %c0_i32 : i32, i32
  }
}

</mosaic_0001>

<bundles_post_ra>
// kernel: fcn_forward.1
= control target key start
LH: loop header
LB: loop body
LE: loop exit
PB: predicated region body
PF: predicated region fallthrough
CT: control target
= control target key end

     0   :  { %10 = vsyncpa [#allocation3], 0  ;;  %s1918_s0 = inlined_call_operand.vmem [shape: f32[2,784], index: 0, kind: input, shape index: {}]   ;;  %s1919_s1 = inlined_call_operand.hbm [shape: bf16[784,256], index: 1, kind: input, shape index: {}]   ;;  %s1920_s2 = inlined_call_operand.vmem [shape: f32[1,256], index: 2, kind: input, shape index: {}]   ;;  %s1921_s3 = inlined_call_operand.vmem [shape: bf16[256,10], index: 3, kind: input, shape index: {}]   ;;  %s1922_s4 = inlined_call_operand.vmem [shape: f32[1,10], index: 4, kind: input, shape index: {}]   ;;  %s1923_s5 = inlined_call_operand.hbm [shape: f32[2,10], index: 5, kind: output, shape index: {}]  }
   0x1   :  { %11 = vsyncpa [#allocation4], 0  ;;  %s18_s20 = sshll.u32 %s1919_s1, 4  ;;  %s1741_s21 = smov [#allocation2]   ;;  %s19_s20 = int_to_ptr.hbm [resolvable:$true] %s18_s20 }
   0x2   :  { %s20_s22 = sshll.u32 %s1741_s21, 4  ;;  %s1742_s23 = smov 128   ;;  %s21_s22 = int_to_ptr.vmem [resolvable:$true] %s20_s22 }
   0x3   :  { %s1743_s24 = smov 8  }
   0x4   :  { %26 = dma.hbm_to_vmem [thread:$0]  %s19_s20, 12544, %s21_s22, [#allocation3], %s1742_s23, %s1742_s23, %s1743_s24  }
   0x5   :  { %1737 = dma.done.wait [#allocation3], 12544  }
   0x6   :  { %1738 = vsyncadd [#allocation3], 4294954752  ;;  %v1168_v0 = vld [vmem:[#allocation2 + $0x70] sm:$0xf]  ;;  %v1583_v1 = vld [vmem:[#allocation2 + $0x74] sm:$0xf0] }
   0x7   :  { %v1296_v2 = vld [vmem:[#allocation2 + $0x170] sm:$0xf]  ;;  %v1169_v3 = vor.u32 %v1583_v1, %v1168_v0  ;;  %v1615_v4 = vld [vmem:[#allocation2 + $0x174] sm:$0xf0]  ;;  %v1160_v11 = vld [vmem:[#allocation2 + $0x60] sm:$0xf] }
   0x8   :  { %v1360_v5 = vld [vmem:[#allocation2 + $0x1f0] sm:$0xf]  ;;  %v1631_v6 = vld [vmem:[#allocation2 + $0x1f4] sm:$0xf0]  ;;  %v1297_v7 = vor.u32 %v1615_v4, %v1296_v2  ;;  %v1581_v13 = vld [vmem:[#allocation2 + $0x64] sm:$0xf0] }
   0x9   :  { %v1361_v8 = vor.u32 %v1631_v6, %v1360_v5  ;;  %v1232_v9 = vld [vmem:[#allocation2 + $0xf0] sm:$0xf]  ;;  %v1599_v10 = vld [vmem:[#allocation2 + $0xf4] sm:$0xf0]  ;;  %726 = vmatpush.bf16.msra.mxu0 %v1169_v3  ;;  %v1288_v14 = vld [vmem:[#allocation2 + $0x160] sm:$0xf]  ;;  %v1161_v16 = vor.u32 %v1581_v13, %v1160_v11 }
   0xa   :  { %v1233_v12 = vor.u32 %v1599_v10, %v1232_v9  ;;  %v1613_v15 = vld [vmem:[#allocation2 + $0x164] sm:$0xf0]  ;;  %754 = vmatpush.bf16.msra.mxu2 %v1297_v7  ;;  %v1352_v18 = vld [vmem:[#allocation2 + $0x1e0] sm:$0xf]  ;;  %v1152_v23 = vld [vmem:[#allocation2 + $0x50] sm:$0xf] }
   0xb   :  { %768 = vmatpush.bf16.msra.mxu3 %v1361_v8  ;;  %v1289_v17 = vor.u32 %v1613_v15, %v1288_v14  ;;  %v1629_v19 = vld [vmem:[#allocation2 + $0x1e4] sm:$0xf0]  ;;  %v1224_v20 = vld [vmem:[#allocation2 + $0xe0] sm:$0xf]  ;;  %v1579_v24 = vld [vmem:[#allocation2 + $0x54] sm:$0xf0] }
   0xc   :  { %740 = vmatpush.bf16.msra.mxu1 %v1233_v12  ;;  %v1353_v21 = vor.u32 %v1629_v19, %v1352_v18  ;;  %v1597_v22 = vld [vmem:[#allocation2 + $0xe4] sm:$0xf0]  ;;  %v1280_v26 = vld [vmem:[#allocation2 + $0x150] sm:$0xf]  ;;  %v1611_v27 = vld [vmem:[#allocation2 + $0x154] sm:$0xf0]  ;;  %v1153_v29 = vor.u32 %v1579_v24, %v1152_v23 }
   0xd   :  { %v1225_v25 = vor.u32 %v1597_v22, %v1224_v20  ;;  %v1344_v28 = vld [vmem:[#allocation2 + $0x1d0] sm:$0xf]  ;;  %727 = vmatpush.bf16.msra.mxu0 %v1161_v16  ;;  %v1627_v30 = vld [vmem:[#allocation2 + $0x1d4] sm:$0xf0]  ;;  %v1281_v33 = vor.u32 %v1611_v27, %v1280_v26  ;;  %v1144_v35 = vld [vmem:[#allocation2 + $0x40] sm:$0xf] }
   0xe   :  { %v1216_v31 = vld [vmem:[#allocation2 + $0xd0] sm:$0xf]  ;;  %v1595_v32 = vld [vmem:[#allocation2 + $0xd4] sm:$0xf0]  ;;  %755 = vmatpush.bf16.msra.mxu2 %v1289_v17  ;;  %v1345_v34 = vor.u32 %v1627_v30, %v1344_v28  ;;  %v1577_v36 = vld [vmem:[#allocation2 + $0x44] sm:$0xf0] }
   0xf   :  { %769 = vmatpush.bf16.msra.mxu3 %v1353_v21  ;;  %v1272_v37 = vld [vmem:[#allocation2 + $0x140] sm:$0xf]  ;;  %v1217_v38 = vor.u32 %v1595_v32, %v1216_v31  ;;  %v1609_v39 = vld [vmem:[#allocation2 + $0x144] sm:$0xf0]  ;;  %v1145_v44 = vor.u32 %v1577_v36, %v1144_v35  ;;  %v1136_v47 = vld [vmem:[#allocation2 + $0x30] sm:$0xf] }
  0x10   :  { %741 = vmatpush.bf16.msra.mxu1 %v1225_v25  ;;  %v1336_v40 = vld [vmem:[#allocation2 + $0x1c0] sm:$0xf]  ;;  %v1625_v41 = vld [vmem:[#allocation2 + $0x1c4] sm:$0xf0]  ;;  %v1273_v45 = vor.u32 %v1609_v39, %v1272_v37  ;;  %v1575_v48 = vld [vmem:[#allocation2 + $0x34] sm:$0xf0] }
  0x11   :  { %v1208_v42 = vld [vmem:[#allocation2 + $0xc0] sm:$0xf]  ;;  %v1593_v43 = vld [vmem:[#allocation2 + $0xc4] sm:$0xf0]  ;;  %728 = vmatpush.bf16.msra.mxu0 %v1153_v29  ;;  %v1337_v46 = vor.u32 %v1625_v41, %v1336_v40  ;;  %v1264_v49 = vld [vmem:[#allocation2 + $0x130] sm:$0xf]  ;;  %v1137_v56 = vor.u32 %v1575_v48, %v1136_v47 }
  0x12   :  { %756 = vmatpush.bf16.msra.mxu2 %v1281_v33  ;;  %v1209_v50 = vor.u32 %v1593_v43, %v1208_v42  ;;  %v1607_v51 = vld [vmem:[#allocation2 + $0x134] sm:$0xf0]  ;;  %v1328_v52 = vld [vmem:[#allocation2 + $0x1b0] sm:$0xf]  ;;  %v1128_v59 = vld [vmem:[#allocation2 + $0x20] sm:$0xf] }
  0x13   :  { %770 = vmatpush.bf16.msra.mxu3 %v1345_v34  ;;  %v1623_v53 = vld [vmem:[#allocation2 + $0x1b4] sm:$0xf0]  ;;  %v1200_v54 = vld [vmem:[#allocation2 + $0xb0] sm:$0xf]  ;;  %v1265_v57 = vor.u32 %v1607_v51, %v1264_v49  ;;  %v1573_v60 = vld [vmem:[#allocation2 + $0x24] sm:$0xf0] }
  0x14   :  { %742 = vmatpush.bf16.msra.mxu1 %v1217_v38  ;;  %v1591_v55 = vld [vmem:[#allocation2 + $0xb4] sm:$0xf0]  ;;  %v1329_v58 = vor.u32 %v1623_v53, %v1328_v52  ;;  %v1256_v61 = vld [vmem:[#allocation2 + $0x120] sm:$0xf]  ;;  %v1605_v63 = vld [vmem:[#allocation2 + $0x124] sm:$0xf0]  ;;  %v1129_v4 = vor.u32 %v1573_v60, %v1128_v59 }
  0x15   :  { %729 = vmatpush.bf16.msra.mxu0 %v1145_v44  ;;  %v1201_v62 = vor.u32 %v1591_v55, %v1200_v54  ;;  %v1320_v0 = vld [vmem:[#allocation2 + $0x1a0] sm:$0xf]  ;;  %v1621_v1 = vld [vmem:[#allocation2 + $0x1a4] sm:$0xf0]  ;;  %v1120_v5 = vld [vmem:[#allocation2 + $0x10] sm:$0xf]  ;;  %v1257_v7 = vor.u32 %v1605_v63, %v1256_v61 }
  0x16   :  { %757 = vmatpush.bf16.msra.mxu2 %v1273_v45  ;;  %v1192_v2 = vld [vmem:[#allocation2 + $0xa0] sm:$0xf]  ;;  %v1589_v3 = vld [vmem:[#allocation2 + $0xa4] sm:$0xf0]  ;;  %v1571_v6 = vld [vmem:[#allocation2 + $0x14] sm:$0xf0]  ;;  %v1321_v8 = vor.u32 %v1621_v1, %v1320_v0 }
  0x17   :  { %771 = vmatpush.bf16.msra.mxu3 %v1337_v46  ;;  %v1248_v9 = vld [vmem:[#allocation2 + $0x110] sm:$0xf]  ;;  %v1603_v10 = vld [vmem:[#allocation2 + $0x114] sm:$0xf0]  ;;  %v1193_v12 = vor.u32 %v1589_v3, %v1192_v2  ;;  %v1112_v16 = vld [vmem:[#allocation2] sm:$0xf]  ;;  %v1121_v19 = vor.u32 %v1571_v6, %v1120_v5 }
  0x18   :  { %743 = vmatpush.bf16.msra.mxu1 %v1209_v50  ;;  %v1312_v11 = vld [vmem:[#allocation2 + $0x190] sm:$0xf]  ;;  %v1619_v13 = vld [vmem:[#allocation2 + $0x194] sm:$0xf0]  ;;  %v1569_v17 = vld [vmem:[#allocation2 + $0x4] sm:$0xf0]  ;;  %v1249_v26 = vor.u32 %v1603_v10, %v1248_v9 }
  0x19   :  { %730 = vmatpush.bf16.msra.mxu0 %v1137_v56  ;;  %v1184_v14 = vld [vmem:[#allocation2 + $0x90] sm:$0xf]  ;;  %v1587_v15 = vld [vmem:[#allocation2 + $0x94] sm:$0xf0]  ;;  %v1240_v20 = vld [vmem:[#allocation2 + $0x100] sm:$0xf]  ;;  %v1313_v27 = vor.u32 %v1619_v13, %v1312_v11  ;;  %v1113_v35 = vor.u32 %v1569_v17, %v1112_v16 }
  0x1a   :  { %758 = vmatpush.bf16.msra.mxu2 %v1265_v57  ;;  %v38_v18 = vld [vmem:[%s1918_s0] sm:$0xff]  ;;  %v1601_v21 = vld [vmem:[#allocation2 + $0x104] sm:$0xf0]  ;;  %v1304_v22 = vld [vmem:[#allocation2 + $0x180] sm:$0xf]  ;;  %v1185_v30 = vor.u32 %v1587_v15, %v1184_v14  ;;  %vm722_vm0 = vcmask 130048  }
  0x1b   :  { %772 = vmatpush.bf16.msra.mxu3 %v1329_v58  ;;  %v40_v23 = vld [vmem:[%s1918_s0 + $0xe] sm:$0xff]  ;;  %v42_v24 = vld [vmem:[%s1918_s0 + $0x1c] sm:$0xff]  ;;  %70 = vst [vmem:[#allocation1] ss:$4 sm:$0xff] %v38_v18  ;;  %v1424_v29 = vld [vmem:[#allocation2 + $0x270] sm:$0xf]  ;;  %v1241_v39 = vor.u32 %v1601_v21, %v1240_v20 }
  0x1c   :  { %744 = vmatpush.bf16.msra.mxu1 %v1201_v62  ;;  %v44_v25 = vld [vmem:[%s1918_s0 + $0x2a] sm:$0xff]  ;;  %72 = vst [vmem:[#allocation1 + $0x1] ss:$4 sm:$0xff] %v40_v23  ;;  %v1647_v31 = vld [vmem:[#allocation2 + $0x274] sm:$0xf0]  ;;  %v46_v47 = vld [vmem:[%s1918_s0 + $0x38] sm:$0xff] }
  0x1d   :  { %731 = vmatpush.bf16.msra.mxu0 %v1129_v4  ;;  %v1617_v28 = vld [vmem:[#allocation2 + $0x184] sm:$0xf0]  ;;  %v1582_v32 = vld [vmem:[#allocation2 + $0x74] sm:$0xf]  ;;  %74 = vst [vmem:[#allocation1 + $0x2] ss:$4 sm:$0xff] %v42_v24  ;;  %v1425_v43 = vor.u32 %v1647_v31, %v1424_v29 }
  0x1e   :  { %759 = vmatpush.bf16.msra.mxu2 %v1257_v7  ;;  %v1170_v33 = vld [vmem:[#allocation2 + $0x78] sm:$0xf0]  ;;  %v1176_v34 = vld [vmem:[#allocation2 + $0x80] sm:$0xf]  ;;  %76 = vst [vmem:[#allocation1 + $0x3] ss:$4 sm:$0xff] %v44_v25  ;;  %v1305_v40 = vor.u32 %v1617_v28, %v1304_v22 }
  0x1f   :  { %773 = vmatpush.bf16.msra.mxu3 %v1321_v8  ;;  %v1585_v36 = vld [vmem:[#allocation2 + $0x84] sm:$0xf0]  ;;  %v1496_v37 = vld [vmem:[#allocation2 + $0x300] sm:$0xf]  ;;  %v1488_v41 = vld [vmem:[#allocation2 + $0x2f0] sm:$0xf]  ;;  %v1173_v44 = vor.u32 %v1582_v32, %v1170_v33 }
  0x20   :  { %745 = vmatpush.bf16.msra.mxu1 %v1193_v12  ;;  %v1665_v38 = vld [vmem:[#allocation2 + $0x304] sm:$0xf0]  ;;  %v1663_v42 = vld [vmem:[#allocation2 + $0x2f4] sm:$0xf0]  ;;  %v1416_v45 = vld [vmem:[#allocation2 + $0x260] sm:$0xf]  ;;  %v1177_v46 = vor.u32 %v1585_v36, %v1176_v34 }
  0x21   :  { %732 = vmatpush.bf16.msra.mxu0 %v1121_v19  ;;  %v1497_v48 = vor.u32 %v1665_v38, %v1496_v37  ;;  %v1645_v49 = vld [vmem:[#allocation2 + $0x264] sm:$0xf0]  ;;  %v1580_v50 = vld [vmem:[#allocation2 + $0x64] sm:$0xf]  ;;  %v1162_v51 = vld [vmem:[#allocation2 + $0x68] sm:$0xf0]  ;;  %v1489_v53 = vor.u32 %v1663_v42, %v1488_v41 }
  0x22   :  { %760 = vmatpush.bf16.msra.mxu2 %v1249_v26  ;;  %v48_v52 = vld [vmem:[%s1918_s0 + $0x46] sm:$0xff]  ;;  %v1661_v55 = vld [vmem:[#allocation2 + $0x2e4] sm:$0xf0]  ;;  %v50_v56 = vld [vmem:[%s1918_s0 + $0x54] sm:$0xff]  ;;  %v1417_v63 = vor.u32 %v1645_v49, %v1416_v45  ;;  %v1165_v0 = vor.u32 %v1580_v50, %v1162_v51  ;;  %vm1088_vm1 = vcmask 80896  }
  0x23   :  { %774 = vmatpush.bf16.msra.mxu3 %v1313_v27  ;;  %v1480_v54 = vld [vmem:[#allocation2 + $0x2e0] sm:$0xf]  ;;  %v1408_v57 = vld [vmem:[#allocation2 + $0x250] sm:$0xf]  ;;  %v1643_v58 = vld [vmem:[#allocation2 + $0x254] sm:$0xf0] }
  0x24   :  { %746 = vmatpush.bf16.msra.mxu1 %v1185_v30  ;;  %v1578_v59 = vld [vmem:[#allocation2 + $0x54] sm:$0xf]  ;;  %v1154_v60 = vld [vmem:[#allocation2 + $0x58] sm:$0xf0]  ;;  %v1481_v4 = vor.u32 %v1661_v55, %v1480_v54  ;;  %v1472_v5 = vld [vmem:[#allocation2 + $0x2d0] sm:$0xf]  ;;  %v1409_v7 = vor.u32 %v1643_v58, %v1408_v57 }
  0x25   :  { %733 = vmatpush.bf16.msra.mxu0 %v1113_v35  ;;  %v85_v61 = vld.sshfl [vmem:[#allocation1] sm:$0xff pattern:$0x73625140]  ;;  %v86_v62 = vld.sshfl [vmem:[#allocation1 + $0x8] sm:$0xff pattern:$0x73625140]  ;;  %v1157_v8 = vor.u32 %v1578_v59, %v1154_v60 }
  0x26   :  { %761 = vmatpush.bf16.msra.mxu2 %v1241_v39  ;;  %v87_v1 = vld.sshfl [vmem:[#allocation1 + $0x10] sm:$0xff pattern:$0x73625140]  ;;  %v88_v2 = vld.sshfl [vmem:[#allocation1 + $0x18] sm:$0xff pattern:$0x73625140] }
  0x27   :  { %775 = vmatpush.bf16.msra.mxu3 %v1305_v40  ;;  %v52_v3 = vld [vmem:[%s1918_s0 + $0x62] sm:$0xff]  ;;  %92 = vst [vmem:[#allocation1] ss:$4 sm:$0xff] %v46_v47  ;;  %v1641_v10 = vld [vmem:[#allocation2 + $0x244] sm:$0xf0] }
  0x28   :  { %747 = vmatpush.bf16.msra.mxu1 %v1177_v46  ;;  %93 = vst [vmem:[#allocation1 + $0x1] ss:$4 sm:$0xff] %v48_v52  ;;  %v1659_v6 = vld [vmem:[#allocation2 + $0x2d4] sm:$0xf0]  ;;  %v1400_v9 = vld [vmem:[#allocation2 + $0x240] sm:$0xf] }
  0x29   :  { %782 = vmatpush.bf16.msrb.mxu0 %v1425_v43  ;;  %94 = vst [vmem:[#allocation1 + $0x2] ss:$4 sm:$0xff] %v50_v56  ;;  %v1576_v11 = vld [vmem:[#allocation2 + $0x44] sm:$0xf]  ;;  %v1146_v12 = vld [vmem:[#allocation2 + $0x48] sm:$0xf0]  ;;  %v1473_v13 = vor.u32 %v1659_v6, %v1472_v5  ;;  %v1401_v16 = vor.u32 %v1641_v10, %v1400_v9 }
  0x2a   :  { %817 = vmatpush.bf16.msrb.mxu2 %v1497_v48  ;;  %95 = vst [vmem:[#allocation1 + $0x3] ss:$4 sm:$0xff] %v52_v3  ;;  %v1464_v14 = vld [vmem:[#allocation2 + $0x2c0] sm:$0xf]  ;;  %v1657_v15 = vld [vmem:[#allocation2 + $0x2c4] sm:$0xf0]  ;;  %v1149_v17 = vor.u32 %v1576_v11, %v1146_v12 }
  0x2b   :  { %824 = vmatpush.bf16.msrb.mxu3 %v1173_v44  ;;  %v1598_v18 = vld [vmem:[#allocation2 + $0xf4] sm:$0xf]  ;;  %v1234_v19 = vld [vmem:[#allocation2 + $0xf8] sm:$0xf0]  ;;  %v1465_v20 = vor.u32 %v1657_v15, %v1464_v14  ;;  %v1392_v21 = vld [vmem:[#allocation2 + $0x230] sm:$0xf] }
  0x2c   :  { %796 = vmatpush.bf16.msrb.mxu1 %v1489_v53  ;;  %v1639_v22 = vld [vmem:[#allocation2 + $0x234] sm:$0xf0]  ;;  %v1574_v23 = vld [vmem:[#allocation2 + $0x34] sm:$0xf]  ;;  %v1596_v24 = vld [vmem:[#allocation2 + $0xe4] sm:$0xf]  ;;  %v1237_v30 = vor.u32 %v1598_v18, %v1234_v19 }
  0x2d   :  { %783 = vmatpush.bf16.msrb.mxu0 %v1417_v63  ;;  %v1226_v25 = vld [vmem:[#allocation2 + $0xe8] sm:$0xf0]  ;;  %v1138_v26 = vld [vmem:[#allocation2 + $0x38] sm:$0xf0]  ;;  %v1456_v27 = vld [vmem:[#allocation2 + $0x2b0] sm:$0xf]  ;;  %v1393_v36 = vor.u32 %v1639_v22, %v1392_v21 }
  0x2e   :  { %v1655_v28 = vld [vmem:[#allocation2 + $0x2b4] sm:$0xf0]  ;;  %v1141_v39 = vor.u32 %v1574_v23, %v1138_v26  ;;  %v1384_v41 = vld [vmem:[#allocation2 + $0x220] sm:$0xf]  ;;  %v1637_v42 = vld [vmem:[#allocation2 + $0x224] sm:$0xf0]  ;;  %v1229_v48 = vor.u32 %v1596_v24, %v1226_v25 }
  0x2f   :  { %825 = vmatpush.bf16.msrb.mxu3 %v1165_v0  ;;  %v1457_v40 = vor.u32 %v1655_v28, %v1456_v27  ;;  %v1572_v43 = vld [vmem:[#allocation2 + $0x24] sm:$0xf]  ;;  %v1594_v44 = vld [vmem:[#allocation2 + $0xd4] sm:$0xf]  ;;  %v1130_v45 = vld [vmem:[#allocation2 + $0x28] sm:$0xf0]  ;;  %v1385_v52 = vor.u32 %v1637_v42, %v1384_v41 }
  0x30   :  { %797 = vmatpush.bf16.msrb.mxu1 %v1481_v4  ;;  %v1448_v46 = vld [vmem:[#allocation2 + $0x2a0] sm:$0xf]  ;;  %v1653_v47 = vld [vmem:[#allocation2 + $0x2a4] sm:$0xf0]  ;;  %v1218_v49 = vld [vmem:[#allocation2 + $0xd8] sm:$0xf0]  ;;  %v1133_v56 = vor.u32 %v1572_v43, %v1130_v45 }
  0x31   :  { %784 = vmatpush.bf16.msrb.mxu0 %v1409_v7  ;;  %v102_v29 = vld.sshfl [vmem:[#allocation1 + $0x10] sm:$0xff pattern:$0x73625140]  ;;  %v100_v31 = vld.sshfl [vmem:[#allocation1] sm:$0xff pattern:$0x73625140]  ;;  %v1449_v57 = vor.u32 %v1653_v47, %v1448_v46  ;;  %v1221_v63 = vor.u32 %v1594_v44, %v1218_v49 }
  0x32   :  { %v1804_v32 = vpack.c.bf16 %v102_v29, %v87_v1  ;;  %v1806_v33 = vpack.c.bf16 %v100_v31, %v85_v61  ;;  %v103_v34 = vld.sshfl [vmem:[#allocation1 + $0x18] sm:$0xff pattern:$0x73625140]  ;;  %v101_v35 = vld.sshfl [vmem:[#allocation1 + $0x8] sm:$0xff pattern:$0x73625140] }
  0x33   :  { %826 = vmatpush.bf16.msrb.mxu3 %v1157_v8  ;;  %v1808_v37 = vpack.c.bf16 %v103_v34, %v88_v2  ;;  %v1810_v38 = vpack.c.bf16 %v101_v35, %v86_v62  ;;  %v1376_v50 = vld [vmem:[#allocation2 + $0x210] sm:$0xf]  ;;  %v1635_v51 = vld [vmem:[#allocation2 + $0x214] sm:$0xf0]  ;;  %v1570_v53 = vld [vmem:[#allocation2 + $0x14] sm:$0xf] }
  0x34   :  { %798 = vmatpush.bf16.msrb.mxu1 %v1473_v13  ;;  %762 = vmatmul.bf16.vlgmr.msra.gmra.mxu2 %v1804_v32  ;;  %v39_v54 = vld [vmem:[%s1918_s0 + $0x8] sm:$0x3f]  ;;  %v41_v55 = vld [vmem:[%s1918_s0 + $0x16] sm:$0x3f]  ;;  %v1122_v58 = vld [vmem:[#allocation2 + $0x18] sm:$0xf0]  ;;  %v1377_v2 = vor.u32 %v1635_v51, %v1376_v50 }
  0x35   :  { %785 = vmatpush.bf16.msrb.mxu0 %v1401_v16  ;;  %838 = vmatpush.bf16.msra.mxu2 %v1237_v30  ;;  %v1440_v59 = vld [vmem:[#allocation2 + $0x290] sm:$0xf]  ;;  %v43_v60 = vld [vmem:[%s1918_s0 + $0x24] sm:$0x3f]  ;;  %v1651_v61 = vld [vmem:[#allocation2 + $0x294] sm:$0xf0]  ;;  %v1125_v5 = vor.u32 %v1570_v53, %v1122_v58 }
  0x36   :  { %734 = vmatmul.bf16.vlgmr.msra.gmra.mxu0 %v1806_v33  ;;  %776 = vmatmul.bf16.vlgmr.msra.gmra.mxu3 %v1808_v37  ;;  %v45_v62 = vld [vmem:[%s1918_s0 + $0x32] sm:$0x3f]  ;;  %78 = vst [vmem:[#allocation1 + $0x20] ss:$4 sm:$0xff] %v39_v54  ;;  %v1592_v0 = vld [vmem:[#allocation2 + $0xc4] sm:$0xf]  ;;  %v1441_v6 = vor.u32 %v1651_v61, %v1440_v59 }
  0x37   :  { %827 = vmatpush.bf16.msrb.mxu3 %v1149_v17  ;;  %748 = vmatmul.bf16.vlgmr.msra.gmra.mxu1 %v1810_v38  ;;  %v1210_v1 = vld [vmem:[#allocation2 + $0xc8] sm:$0xf0]  ;;  %80 = vst [vmem:[#allocation1 + $0x21] ss:$4 sm:$0xff] %v41_v55  ;;  %v1368_v3 = vld [vmem:[#allocation2 + $0x200] sm:$0xf] }
  0x38   :  { %799 = vmatpush.bf16.msrb.mxu1 %v1465_v20  ;;  %v1633_v4 = vld [vmem:[#allocation2 + $0x204] sm:$0xf0]  ;;  %82 = vst [vmem:[#allocation1 + $0x22] ss:$4 sm:$0xff] %v43_v60  ;;  %v1568_v7 = vld [vmem:[#allocation2 + $0x4] sm:$0xf]  ;;  %v1213_v13 = vor.u32 %v1592_v0, %v1210_v1 }
  0x39   :  { %786 = vmatpush.bf16.msrb.mxu0 %v1393_v36  ;;  %839 = vmatpush.bf16.msra.mxu2 %v1229_v48  ;;  %84 = vst [vmem:[#allocation1 + $0x23] ss:$4 sm:$0xff] %v45_v62  ;;  %v1114_v8 = vld [vmem:[#allocation2 + $0x8] sm:$0xf0]  ;;  %v1590_v9 = vld [vmem:[#allocation2 + $0xb4] sm:$0xf]  ;;  %v1369_v18 = vor.u32 %v1633_v4, %v1368_v3 }
  0x3a   :  { %v1614_v10 = vld [vmem:[#allocation2 + $0x174] sm:$0xf]  ;;  %v1298_v11 = vld [vmem:[#allocation2 + $0x178] sm:$0xf0]  ;;  %v1432_v15 = vld [vmem:[#allocation2 + $0x280] sm:$0xf]  ;;  %v1117_v22 = vor.u32 %v1568_v7, %v1114_v8 }
  0x3b   :  { %828 = vmatpush.bf16.msrb.mxu3 %v1141_v39  ;;  %v1646_v12 = vld [vmem:[#allocation2 + $0x274] sm:$0xf]  ;;  %v1426_v14 = vld [vmem:[#allocation2 + $0x278] sm:$0xf0]  ;;  %v1649_v16 = vld [vmem:[#allocation2 + $0x284] sm:$0xf0]  ;;  %v1301_v23 = vor.u32 %v1614_v10, %v1298_v11 }
  0x3c   :  { %800 = vmatpush.bf16.msrb.mxu1 %v1457_v40  ;;  %v1202_v17 = vld [vmem:[#allocation2 + $0xb8] sm:$0xf0]  ;;  %v1630_v19 = vld [vmem:[#allocation2 + $0x1f4] sm:$0xf]  ;;  %v1588_v24 = vld [vmem:[#allocation2 + $0xa4] sm:$0xf]  ;;  %v1429_v27 = vor.u32 %v1646_v12, %v1426_v14  ;;  %v1433_v28 = vor.u32 %v1649_v16, %v1432_v15 }
  0x3d   :  { %787 = vmatpush.bf16.msrb.mxu0 %v1385_v52  ;;  %840 = vmatpush.bf16.msra.mxu2 %v1221_v63  ;;  %v1362_v20 = vld [vmem:[#allocation2 + $0x1f8] sm:$0xf0]  ;;  %v1194_v25 = vld [vmem:[#allocation2 + $0xa8] sm:$0xf0]  ;;  %v49_v26 = vld [vmem:[%s1918_s0 + $0x4e] sm:$0x3f]  ;;  %v1205_v34 = vor.u32 %v1590_v9, %v1202_v17 }
  0x3e   :  { %v47_v21 = vld [vmem:[%s1918_s0 + $0x40] sm:$0x3f]  ;;  %v1612_v29 = vld [vmem:[#allocation2 + $0x164] sm:$0xf]  ;;  %v1290_v30 = vld [vmem:[#allocation2 + $0x168] sm:$0xf0]  ;;  %v1365_v36 = vor.u32 %v1630_v19, %v1362_v20  ;;  %v1197_v52 = vor.u32 %v1588_v24, %v1194_v25 }
  0x3f   :  { %829 = vmatpush.bf16.msrb.mxu3 %v1133_v56  ;;  %v1644_v31 = vld [vmem:[#allocation2 + $0x264] sm:$0xf]  ;;  %v51_v35 = vld [vmem:[%s1918_s0 + $0x5c] sm:$0x3f]  ;;  %v1418_v39 = vld [vmem:[#allocation2 + $0x268] sm:$0xf0]  ;;  %v1293_v46 = vor.u32 %v1612_v29, %v1290_v30 }
  0x40   :  { %801 = vmatpush.bf16.msrb.mxu1 %v1449_v57  ;;  %v1628_v40 = vld [vmem:[#allocation2 + $0x1e4] sm:$0xf]  ;;  %v1354_v41 = vld [vmem:[#allocation2 + $0x1e8] sm:$0xf0]  ;;  %v1586_v47 = vld [vmem:[#allocation2 + $0x94] sm:$0xf]  ;;  %v1421_v49 = vor.u32 %v1644_v31, %v1418_v39 }
  0x41   :  { %788 = vmatpush.bf16.msrb.mxu0 %v1377_v2  ;;  %841 = vmatpush.bf16.msra.mxu2 %v1213_v13  ;;  %v89_v42 = vld.sshfl [vmem:[#allocation1 + $0x20] sm:$0xff pattern:$0x73625140]  ;;  %v1837_v43 = vld.sshfl [vmem:[#allocation1 + $0x28] sm:$0xff pattern:$0x73625140]  ;;  %v1357_v53 = vor.u32 %v1628_v40, %v1354_v41 }
  0x42   :  { %v53_v44 = vld [vmem:[%s1918_s0 + $0x6a] sm:$0x3f]  ;;  %v91_v45 = vld.sshfl [vmem:[#allocation1 + $0x30] sm:$0xff pattern:$0x73625140] }
  0x43   :  { %830 = vmatpush.bf16.msrb.mxu3 %v1125_v5  ;;  %v1186_v48 = vld [vmem:[#allocation2 + $0x98] sm:$0xf0]  ;;  %96 = vst [vmem:[#allocation1 + $0x20] ss:$4 sm:$0xff] %v47_v21  ;;  %v1610_v50 = vld [vmem:[#allocation2 + $0x154] sm:$0xf] }
  0x44   :  { %802 = vmatpush.bf16.msrb.mxu1 %v1441_v6  ;;  %v1282_v51 = vld [vmem:[#allocation2 + $0x158] sm:$0xf0]  ;;  %97 = vst [vmem:[#allocation1 + $0x21] ss:$4 sm:$0xff] %v49_v26  ;;  %v1642_v54 = vld [vmem:[#allocation2 + $0x254] sm:$0xf]  ;;  %v1189_v62 = vor.u32 %v1586_v47, %v1186_v48 }
  0x45   :  { %789 = vmatpush.bf16.msrb.mxu0 %v1369_v18  ;;  %842 = vmatpush.bf16.msra.mxu2 %v1205_v34  ;;  %v1410_v55 = vld [vmem:[#allocation2 + $0x258] sm:$0xf0]  ;;  %98 = vst [vmem:[#allocation1 + $0x22] ss:$4 sm:$0xff] %v51_v35  ;;  %v1626_v56 = vld [vmem:[#allocation2 + $0x1d4] sm:$0xf]  ;;  %v1285_v58 = vor.u32 %v1610_v50, %v1282_v51 }
  0x46   :  { %v1346_v57 = vld [vmem:[#allocation2 + $0x1d8] sm:$0xf0]  ;;  %99 = vst [vmem:[#allocation1 + $0x23] ss:$4 sm:$0xff] %v53_v44  ;;  %v1413_v59 = vor.u32 %v1642_v54, %v1410_v55  ;;  %v1608_v60 = vld [vmem:[#allocation2 + $0x144] sm:$0xf] }
  0x47   :  { %831 = vmatpush.bf16.msrb.mxu3 %v1117_v22  ;;  %v1274_v61 = vld [vmem:[#allocation2 + $0x148] sm:$0xf0]  ;;  %v1349_v63 = vor.u32 %v1626_v56, %v1346_v57  ;;  %v1640_v0 = vld [vmem:[#allocation2 + $0x244] sm:$0xf]  ;;  %v1662_v4 = vld [vmem:[#allocation2 + $0x2f4] sm:$0xf] }
  0x48   :  { %803 = vmatpush.bf16.msrb.mxu1 %v1433_v28  ;;  %v1402_v1 = vld [vmem:[#allocation2 + $0x248] sm:$0xf0]  ;;  %v1584_v2 = vld [vmem:[#allocation2 + $0x84] sm:$0xf]  ;;  %v1490_v5 = vld [vmem:[#allocation2 + $0x2f8] sm:$0xf0] }
  0x49   :  { %852 = vmatpush.bf16.msra.mxu0 %v1301_v23  ;;  %843 = vmatpush.bf16.msra.mxu2 %v1197_v52  ;;  %v1178_v3 = vld [vmem:[#allocation2 + $0x88] sm:$0xf0]  ;;  %v1405_v6 = vor.u32 %v1640_v0, %v1402_v1  ;;  %v1624_v7 = vld [vmem:[#allocation2 + $0x1c4] sm:$0xf]  ;;  %v1606_v9 = vld [vmem:[#allocation2 + $0x134] sm:$0xf]  ;;  %v1493_v19 = vor.u32 %v1662_v4, %v1490_v5 }
  0x4a   :  { %832 = vmatmul.bf16.vlgmr.msrb.gmra.mxu3 %v1806_v33  ;;  %v1277_v33 = vor.u32 %v1608_v60, %v1274_v61  ;;  %v1338_v8 = vld [vmem:[#allocation2 + $0x1c8] sm:$0xf0]  ;;  %v1266_v10 = vld [vmem:[#allocation2 + $0x138] sm:$0xf0]  ;;  %v1638_v11 = vld [vmem:[#allocation2 + $0x234] sm:$0xf]  ;;  %v1181_v15 = vor.u32 %v1584_v2, %v1178_v3 }
  0x4b   :  { %880 = vmatpush.bf16.msra.mxu3 %v1429_v27  ;;  %v1394_v12 = vld [vmem:[#allocation2 + $0x238] sm:$0xf0]  ;;  %v1660_v16 = vld [vmem:[#allocation2 + $0x2e4] sm:$0xf]  ;;  %v1482_v21 = vld [vmem:[#allocation2 + $0x2e8] sm:$0xf0]  ;;  %v1341_v22 = vor.u32 %v1624_v7, %v1338_v8  ;;  %v1269_v24 = vor.u32 %v1606_v9, %v1266_v10 }
  0x4c   :  { %866 = vmatpush.bf16.msra.mxu1 %v1365_v36  ;;  %v1397_v25 = vor.u32 %v1638_v11, %v1394_v12  ;;  %v1622_v26 = vld [vmem:[#allocation2 + $0x1b4] sm:$0xf]  ;;  %v1330_v27 = vld [vmem:[#allocation2 + $0x1b8] sm:$0xf0]  ;;  %v1604_v28 = vld [vmem:[#allocation2 + $0x124] sm:$0xf]  ;;  %v1485_v34 = vor.u32 %v1660_v16, %v1482_v21 }
  0x4d   :  { %853 = vmatpush.bf16.msra.mxu0 %v1293_v46  ;;  %844 = vmatpush.bf16.msra.mxu2 %v1189_v62  ;;  %v106_v13 = vld.sshfl [vmem:[#allocation1 + $0x30] sm:$0xff pattern:$0x73625140]  ;;  %v104_v14 = vld.sshfl [vmem:[#allocation1 + $0x20] sm:$0xff pattern:$0x73625140]  ;;  %v1333_v39 = vor.u32 %v1622_v26, %v1330_v27 }
  0x4e   :  { %v1843_v17 = vpack.c.bf16 %v106_v13, %v91_v45  ;;  %v1845_v18 = vpack.c.bf16 %v104_v14, %v89_v42  ;;  %v105_v20 = vld.sshfl [vmem:[#allocation1 + $0x28] sm:$0xff pattern:$0x73625140]  ;;  %v1258_v29 = vld [vmem:[#allocation2 + $0x128] sm:$0xf0] }
  0x4f   :  { %881 = vmatpush.bf16.msra.mxu3 %v1421_v49  ;;  %v1848_v23 = vpack.c.bf16 %v105_v20, %v1837_v43  ;;  %v1636_v30 = vld [vmem:[#allocation2 + $0x224] sm:$0xf]  ;;  %v1386_v31 = vld [vmem:[#allocation2 + $0x228] sm:$0xf0]  ;;  %v1658_v35 = vld [vmem:[#allocation2 + $0x2d4] sm:$0xf]  ;;  %v1261_v40 = vor.u32 %v1604_v28, %v1258_v29 }
  0x50   :  { %867 = vmatpush.bf16.msra.mxu1 %v1357_v53  ;;  %1502 = vmatmul.msk.bf16.vlgmr.msrb.gmra.mxu2 %vm722_vm0, %v1843_v17  ;;  %v1474_v36 = vld [vmem:[#allocation2 + $0x2d8] sm:$0xf0]  ;;  %v1389_v41 = vor.u32 %v1636_v30, %v1386_v31  ;;  %v1620_v42 = vld [vmem:[#allocation2 + $0x1a4] sm:$0xf]  ;;  %v1322_v43 = vld [vmem:[#allocation2 + $0x1a8] sm:$0xf0] }
  0x51   :  { %854 = vmatpush.bf16.msra.mxu0 %v1285_v58  ;;  %845 = vmatpush.bf16.msra.mxu2 %v1181_v15  ;;  %v1602_v44 = vld [vmem:[#allocation2 + $0x114] sm:$0xf]  ;;  %v1250_v45 = vld [vmem:[#allocation2 + $0x118] sm:$0xf0]  ;;  %v1477_v48 = vor.u32 %v1658_v35, %v1474_v36  ;;  %v1656_v49 = vld [vmem:[#allocation2 + $0x2c4] sm:$0xf]  ;;  %v1325_v51 = vor.u32 %v1620_v42, %v1322_v43 }
  0x52   :  { %790 = vmatmul.bf16.vlgmr.msrb.gmra.mxu0 %v1845_v18  ;;  %804 = vmatmul.bf16.vlgmr.msrb.gmra.mxu1 %v1848_v23  ;;  %v1634_v46 = vld [vmem:[#allocation2 + $0x214] sm:$0xf]  ;;  %v1378_v47 = vld [vmem:[#allocation2 + $0x218] sm:$0xf0]  ;;  %v1466_v50 = vld [vmem:[#allocation2 + $0x2c8] sm:$0xf0]  ;;  %v1253_v52 = vor.u32 %v1602_v44, %v1250_v45 }
  0x53   :  { %882 = vmatpush.bf16.msra.mxu3 %v1413_v59  ;;  %v1381_v53 = vor.u32 %v1634_v46, %v1378_v47  ;;  %v1618_v54 = vld [vmem:[#allocation2 + $0x194] sm:$0xf]  ;;  %v1314_v55 = vld [vmem:[#allocation2 + $0x198] sm:$0xf0]  ;;  %v1600_v56 = vld [vmem:[#allocation2 + $0x104] sm:$0xf]  ;;  %v1469_v62 = vor.u32 %v1656_v49, %v1466_v50 }
  0x54   :  { %868 = vmatpush.bf16.msra.mxu1 %v1349_v63  ;;  %v1242_v57 = vld [vmem:[#allocation2 + $0x108] sm:$0xf0]  ;;  %v1632_v58 = vld [vmem:[#allocation2 + $0x204] sm:$0xf]  ;;  %v1654_v63 = vld [vmem:[#allocation2 + $0x2b4] sm:$0xf]  ;;  %v1317_v0 = vor.u32 %v1618_v54, %v1314_v55 }
  0x55   :  { %855 = vmatpush.bf16.msra.mxu0 %v1277_v33  ;;  %894 = vmatpush.bf16.msrb.mxu2 %v1493_v19  ;;  %v1370_v59 = vld [vmem:[#allocation2 + $0x208] sm:$0xf0]  ;;  %v1664_v60 = vld [vmem:[#allocation2 + $0x304] sm:$0xf]  ;;  %v1458_v1 = vld [vmem:[#allocation2 + $0x2b8] sm:$0xf0]  ;;  %v1245_v2 = vor.u32 %v1600_v56, %v1242_v57 }
  0x56   :  { %v1498_v61 = vld [vmem:[#allocation2 + $0x308] sm:$0xf0]  ;;  %v1373_v3 = vor.u32 %v1632_v58, %v1370_v59  ;;  %v1616_v4 = vld [vmem:[#allocation2 + $0x184] sm:$0xf]  ;;  %v1650_v11 = vld [vmem:[#allocation2 + $0x294] sm:$0xf] }
  0x57   :  { %883 = vmatpush.bf16.msra.mxu3 %v1405_v6  ;;  %v1306_v5 = vld [vmem:[#allocation2 + $0x188] sm:$0xf0]  ;;  %v1501_v33 = vor.u32 %v1664_v60, %v1498_v61  ;;  %v1461_v6 = vor.u32 %v1654_v63, %v1458_v1  ;;  %v1652_v8 = vld [vmem:[#allocation2 + $0x2a4] sm:$0xf]  ;;  %v1442_v12 = vld [vmem:[#allocation2 + $0x298] sm:$0xf0] }
  0x58   :  { %869 = vmatpush.bf16.msra.mxu1 %v1341_v22  ;;  %v1309_v7 = vor.u32 %v1616_v4, %v1306_v5  ;;  %v1450_v9 = vld [vmem:[#allocation2 + $0x2a8] sm:$0xf0]  ;;  %v1445_v13 = vor.u32 %v1650_v11, %v1442_v12  ;;  %v1648_v14 = vld [vmem:[#allocation2 + $0x284] sm:$0xf]  ;;  %v1681_v36 = vld [vmem:[%s1921_s3 + $0x78] sm:$0xff] }
  0x59   :  { %856 = vmatpush.bf16.msra.mxu0 %v1269_v24  ;;  %895 = vmatpush.bf16.msrb.mxu2 %v1485_v34  ;;  %v1453_v10 = vor.u32 %v1652_v8, %v1450_v9  ;;  %v1434_v15 = vld [vmem:[#allocation2 + $0x288] sm:$0xf0]  ;;  %v1667_v20 = vld [vmem:[%s1921_s3 + $0x8] sm:$0xff]  ;;  %v1666_v24 = vld [vmem:[%s1921_s3] sm:$0xff] }
  0x5a   :  { %v1437_v16 = vor.u32 %v1648_v14, %v1434_v15  ;;  %v1668_v19 = vld [vmem:[%s1921_s3 + $0x10] sm:$0xff]  ;;  %v1679_v47 = vld [vmem:[%s1921_s3 + $0x68] sm:$0xff]  ;;  %v1677_v57 = vld [vmem:[%s1921_s3 + $0x58] sm:$0xff] }
  0x5b   :  { %884 = vmatpush.bf16.msra.mxu3 %v1397_v25  ;;  %v1680_v42 = vld [vmem:[%s1921_s3 + $0x70] sm:$0xff]  ;;  %v1675_v4 = vld [vmem:[%s1921_s3 + $0x48] sm:$0xff] }
  0x5c   :  { %870 = vmatpush.bf16.msra.mxu1 %v1333_v39 }
  0x5d   :  { %857 = vmatpush.bf16.msra.mxu0 %v1261_v40  ;;  %896 = vmatpush.bf16.msrb.mxu2 %v1477_v48 }
  0x5f   :  { %885 = vmatpush.bf16.msra.mxu3 %v1389_v41 }
  0x60   :  { %871 = vmatpush.bf16.msra.mxu1 %v1325_v51  ;;  %846 = vmatmul.bf16.vlgmr.msra.gmra.mxu2 %v1810_v38  ;;  %v1671_v38 = vld [vmem:[%s1921_s3 + $0x28] sm:$0xff] }
  0x61   :  { %858 = vmatpush.bf16.msra.mxu0 %v1253_v52  ;;  %897 = vmatpush.bf16.msrb.mxu2 %v1469_v62  ;;  %v1678_v52 = vld [vmem:[%s1921_s3 + $0x60] sm:$0xff]  ;;  %v1676_v62 = vld [vmem:[%s1921_s3 + $0x50] sm:$0xff] }
  0x63   :  { %886 = vmatpush.bf16.msra.mxu3 %v1381_v53 }
  0x64   :  { %872 = vmatpush.bf16.msra.mxu1 %v1317_v0 }
  0x65   :  { %859 = vmatpush.bf16.msra.mxu0 %v1245_v2  ;;  %898 = vmatpush.bf16.msrb.mxu2 %v1461_v6  ;;  %v1674_v6 = vld [vmem:[%s1921_s3 + $0x40] sm:$0xff] }
  0x67   :  { %887 = vmatpush.bf16.msra.mxu3 %v1373_v3 }
  0x68   :  { %873 = vmatpush.bf16.msra.mxu1 %v1309_v7  ;;  %860 = vmatmul.bf16.vlgmr.msra.gmra.mxu0 %v1804_v32  ;;  %v1673_v32 = vld [vmem:[%s1921_s3 + $0x38] sm:$0xff] }
  0x69   :  { %915 = vmatpush.bf16.msrb.mxu0 %v1501_v33  ;;  %899 = vmatpush.bf16.msrb.mxu2 %v1453_v10 }
  0x6a   :  { %888 = vmatmul.bf16.vlgmr.msra.gmra.mxu3 %v1845_v18  ;;  %v1670_v18 = vld [vmem:[%s1921_s3 + $0x20] sm:$0xff] }
  0x6b   :  { %874 = vmatmul.bf16.vlgmr.msra.gmra.mxu1 %v1808_v37  ;;  %v1672_v37 = vld [vmem:[%s1921_s3 + $0x30] sm:$0xff]  ;;  %1074 = vmatpush.bf16.msrb.mxu3 %v1681_v36 }
  0x6c   :  { %1060 = vmatpush.bf16.msrb.mxu1 %v1673_v32 }
  0x6d   :  { %900 = vmatpush.bf16.msrb.mxu2 %v1445_v13 }
  0x6f   :  { %1075 = vmatpush.bf16.msrb.mxu3 %v1680_v42 }
  0x70   :  { %1061 = vmatpush.bf16.msrb.mxu1 %v1672_v37 }
  0x71   :  { %901 = vmatpush.bf16.msrb.mxu2 %v1437_v16 }
  0x73   :  { %1076 = vmatpush.bf16.msrb.mxu3 %v1679_v47 }
  0x74   :  { %902 = vmatmul.bf16.vlgmr.msrb.gmra.mxu2 %v1848_v23  ;;  %1062 = vmatpush.bf16.msrb.mxu1 %v1671_v38  ;;  %v226_v23 = vld [vmem:[%s1920_s2] sm:$0x3] }
  0x75   :  { %v228_v25 = vperm.slane %v226_v23, 0  ;;  %v229_v33 = vperm.slane %v226_v23, 1 }
  0x77   :  { %1077 = vmatpush.bf16.msrb.mxu3 %v1678_v52 }
  0x78   :  { %1503 = vmatmul.msk.bf16.vlgmr.msrb.gmra.mxu0 %vm722_vm0, %v1843_v17  ;;  %1063 = vmatpush.bf16.msrb.mxu1 %v1670_v18  ;;  %v1669_v17 = vld [vmem:[%s1921_s3 + $0x18] sm:$0xff] }
  0x7b   :  { %1078 = vmatpush.bf16.msrb.mxu3 %v1677_v57 }
  0x7c   :  { %1064 = vmatpush.bf16.msrb.mxu1 %v1669_v17 }
  0x7f   :  { %1079 = vmatpush.bf16.msrb.mxu3 %v1676_v62 }
  0x80   :  { %1065 = vmatpush.bf16.msrb.mxu1 %v1668_v19 }
  0x83   :  { %1080 = vmatpush.bf16.msrb.mxu3 %v1675_v4 }
  0x84   :  { %1066 = vmatpush.bf16.msrb.mxu1 %v1667_v20 }
  0x87   :  { %1081 = vmatpush.bf16.msrb.mxu3 %v1674_v6 }
  0x88   :  { %1067 = vmatpush.bf16.msrb.mxu1 %v1666_v24 }
  0xb3   :  { %v735_v21 = vpop.f32.mrf.mxu0 }
  0xb4   :  { %v749_v22 = vpop.f32.mrf.mxu1  ;;  %v736_v27 = vadd.f32 %v735_v21, %v228_v25 }
  0xb6   :  { %v750_v31 = vadd.f32 %v749_v22, %v736_v27 }
  0xb7   :  { %v763_v26 = vpop.f32.mrf.mxu2 }
  0xb8   :  { %v764_v39 = vadd.f32 %v763_v26, %v750_v31 }
  0xb9   :  { %v777_v30 = vpop.f32.mrf.mxu3 }
  0xba   :  { %v778_v44 = vadd.f32 %v777_v30, %v764_v39 }
  0xbb   :  { %v737_v28 = vpop.f32.mrf.mxu0 }
  0xbc   :  { %v751_v29 = vpop.f32.mrf.mxu1  ;;  %v738_v34 = vadd.f32 %v737_v28, %v228_v25 }
  0xbe   :  { %v752_v40 = vadd.f32 %v751_v29, %v738_v34  ;;  %v1688_v34 = vld [vmem:[%s1922_s4] ss:$0 sm:$0xff] }
  0xbf   :  { %v765_v35 = vpop.f32.mrf.mxu2 }
  0xc0   :  { %v766_v45 = vadd.f32 %v765_v35, %v752_v40 }
  0xc1   :  { %v779_v46 = vpop.f32.mrf.mxu3 }
  0xc2   :  { %v780_v50 = vadd.f32 %v779_v46, %v766_v45 }
  0xcd   :  { %v833_v59 = vpop.f32.mrf.mxu3 }
  0xce   :  { %v834_v8 = vadd.f32 %v833_v59, %v229_v33 }
  0xcf   :  { %v791_v41 = vpop.f32.mrf.mxu0  ;;  %v805_v43 = vpop.f32.mrf.mxu1 }
  0xd0   :  { %v792_v48 = vadd.f32 %v791_v41, %v778_v44 }
  0xd2   :  { %v806_v53 = vadd.f32 %v805_v43, %v792_v48 }
  0xd3   :  { %v819_v49 = vpop.f32.mrf.mxu2 }
  0xd4   :  { %v820_v58 = vadd.f32 %v819_v49, %v806_v53 }
  0xd5   :  { %v835_v5 = vpop.f32.mrf.mxu3 }
  0xd6   :  { %v922_v63 = vmax.f32 %v820_v58, 0.0  ;;  %v836_v13 = vadd.f32 %v835_v5, %v229_v33 }
  0xd7   :  { %v793_v51 = vpop.f32.mrf.mxu0  ;;  %v807_v55 = vpop.f32.mrf.mxu1 }
  0xd8   :  { %v794_v54 = vadd.f32 %v793_v51, %v780_v50 }
  0xda   :  { %v808_v56 = vadd.f32 %v807_v55, %v794_v54 }
  0xdb   :  { %v821_v60 = vpop.f32.mrf.mxu2 }
  0xdc   :  { %v822_v61 = vadd.f32 %v821_v60, %v808_v56 }
  0xde   :  { %v924_v0 = vmax.f32 %v822_v61, 0.0 }
  0xe0   :  { %v926_v1 = vpack.c.bf16 %v924_v0, %v922_v63 }
  0xe2   :  { %1068 = vmatmul.bf16.vlgmr.msrb.gmra.mxu1 %v926_v1 }
  0xe3   :  { %v847_v3 = vpop.f32.mrf.mxu2 }
  0xe4   :  { %v848_v12 = vadd.f32 %v847_v3, %v834_v8 }
  0xe5   :  { %v861_v2 = vpop.f32.mrf.mxu0 }
  0xe6   :  { %v862_v15 = vadd.f32 %v861_v2, %v848_v12 }
  0xe8   :  { %v875_v9 = vpop.f32.mrf.mxu1 }
  0xe9   :  { %v876_v18 = vadd.f32 %v875_v9, %v862_v15 }
  0xeb   :  { %v849_v10 = vpop.f32.mrf.mxu2 }
  0xec   :  { %v850_v14 = vadd.f32 %v849_v10, %v836_v13 }
  0xed   :  { %v863_v7 = vpop.f32.mrf.mxu0  ;;  %v889_v11 = vpop.f32.mrf.mxu3 }
  0xee   :  { %v864_v32 = vadd.f32 %v863_v7, %v850_v14  ;;  %v890_v19 = vadd.f32 %v889_v11, %v876_v18 }
  0xf0   :  { %v877_v38 = vpop.f32.mrf.mxu1 }
  0xf1   :  { %v878_v20 = vadd.f32 %v877_v38, %v864_v32 }
  0xf5   :  { %v917_v16 = vpop.f32.mrf.mxu0  ;;  %v891_v17 = vpop.f32.mrf.mxu3 }
  0xf6   :  { %v892_v21 = vadd.f32 %v891_v17, %v878_v20 }
  0xf7   :  { %v903_v37 = vpop.f32.mrf.mxu2 }
  0xf8   :  { %v904_v22 = vadd.f32 %v903_v37, %v890_v19 }
  0xfa   :  { %v918_v25 = vadd.f32 %v917_v16, %v904_v22 }
  0xfc   :  { %v923_v28 = vmax.f32 %v918_v25, 0.0 }
  0xfd   :  { %v919_v24 = vpop.f32.mrf.mxu0 }
  0xff   :  { %v905_v23 = vpop.f32.mrf.mxu2 }
 0x100   :  { %v906_v26 = vadd.f32 %v905_v23, %v892_v21 }
 0x102   :  { %v920_v27 = vadd.f32 %v919_v24, %v906_v26 }
 0x104   :  { %v925_v29 = vmax.f32 %v920_v27, 0.0 }
 0x106   :  { %v927_v30 = vpack.c.bf16 %v925_v29, %v923_v28 }
 0x108   :  { %1082 = vmatmul.bf16.vlgmr.msrb.gmra.mxu3 %v927_v30 }
 0x15f   :  { %v1069_v31 = vpop.f32.mrf.mxu1 }
 0x160   :  { %v1070_v35 = vadd.f32 %v1688_v34, %v1069_v31 }
 0x167   :  { %v1071_v40 = vpop.f32.mrf.mxu1 }
 0x168   :  { %v1072_v41 = vadd.f32 %v1688_v34, %v1071_v40 }
 0x18b   :  { %v1083_v36 = vpop.f32.mrf.mxu3 }
 0x18c   :  { %v1084_v39 = vadd.f32 %v1083_v36, %v1070_v35 }
 0x18e   :  { %1089 = vst.msk [vmem:[#allocation5] sm:$0xff] %vm1088_vm1, %v1084_v39 }
 0x193   :  { %v1085_v42 = vpop.f32.mrf.mxu3 }
 0x194   :  { %v1086_v43 = vadd.f32 %v1085_v42, %v1072_v41 }
 0x196   :  { %1090 = vst.msk [vmem:[#allocation5 + $0x8] sm:$0xff] %vm1088_vm1, %v1086_v43 }
 0x197   :  { %1094 = vsyncadd [#allocation4], 224  ;;  %s1097_s13 = sshll.u32 %s1923_s5, 4  ;;  %s1744_s14 = smov [#allocation5]   ;;  %s1098_s13 = int_to_ptr.hbm [resolvable:$true] %s1097_s13 }
 0x198   :  { %s1095_s15 = sshll.u32 %s1744_s14, 4  ;;  %s1745_s4 = smov 32   ;;  %s1096_s15 = int_to_ptr.vmem [resolvable:$true] %s1095_s15 }
 0x199   :  { %s1746_s16 = smov 2  }
 0x19a   :  { %1103 = dma.vmem_to_hbm [thread:$0]  %s1096_s15, 32, %s1098_s13, [#allocation4], %s1745_s4, %s1745_s4, %s1746_s16  }
 0x19b   :  { %1739 = dma.done.wait [#allocation4], 256  }
 0x19c   :  { %1740 = vsyncadd [#allocation4], 4294967040 }
 0x19d   :  { %1108 = vsyncpa [#allocation3], 1 }
 0x19e   :  { %1109 = vsyncpa [#allocation4], 1 }

</bundles_post_ra>
